<compile_context>
chip_gen: v6e
topology: v6e:2x2x1
jax: 0.10.0
libtpu: 0.0.40
codegen_flags: <defaults>
</compile_context>

<pallas_src>
import functools

import jax
import jax.numpy as jnp
from jax.experimental import pallas as pl
from jax.experimental.pallas import tpu as pltpu

# ---- model configuration (stand-ins for common_resource) -------------------
OBS_PERIOD = 4                          # common_resource.observation_period_num
NUM_EXPLAIN = 4                         # common_resource.num_explain
INPUT_SIZE = OBS_PERIOD * NUM_EXPLAIN   # 16
HIDDEN = 32                             # common_resource.hidden_size
OUTPUT = NUM_EXPLAIN                    # 4
NUM_LAYERS = 4
BATCH = 2

LANES = 4 * HIDDEN                      # 128: one full lane group per gate slab
_ROW_MIN = 8                            # sublane granularity
_ROW_MAX = 512                          # big tiles amortize per-step overhead


def _lstm_step(gates, hidden):
    """One collapsed (seq_len=1, zero-state) LSTM cell at full 128-lane width.

    Gate-lane layout of `gates` (and of its tanh):
      [0:H)   = 0.5*z_i          [H:2H)  = 0.5*z_o (dup #1)
      [2H:3H) =     z_g          [3H:4H) = 0.5*z_o (dup #2)
    Only lanes [2H:3H) of the result are live; every other lane carries bounded
    (-1, 1) garbage that the next matmul's zero weight rows kill.
    """
    t = jnp.tanh(gates)                                  # ONE full-slab EUP tanh
    # sigmoid(z) = 0.5 + 0.5 * tanh(z/2); rotate tanh(0.5*z_i) / tanh(0.5*z_o)
    # onto the g lanes.  Static-shift jnp.roll -> lane slice + concat (portable).
    sig_i = 0.5 + 0.5 * jnp.roll(t, 2 * hidden, axis=1)  # z_i lands on [2H:3H)
    c = sig_i * t                                        # [2H:3H): sig(z_i)*tanh(z_g)
    sig_o = 0.5 + 0.5 * jnp.roll(t, hidden, axis=1)      # o dup #1 lands on [2H:3H)
    return sig_o * jnp.tanh(c)                           # new hidden on [2H:3H)


def _predictor_kernel(x_ref, w0_ref, w_ref, b_ref, out_ref, *, hidden, num_layers):
    """4 single-step LSTM layers + Mish + Linear + tanh*7 for one row tile."""
    # ---- layer 0: K=16 contraction straight off the un-padded input --------
    x = x_ref[...].astype(jnp.bfloat16)
    gates = jnp.dot(x, w0_ref[...],
                    preferred_element_type=jnp.float32) + b_ref[0]
    h = _lstm_step(gates, hidden)                        # f32 (rows, 128)

    # ---- layers 1..3: K=128 contractions, live weight rows at [2H:3H) ------
    for layer in range(1, num_layers):
        gates = jnp.dot(h.astype(jnp.bfloat16), w_ref[layer - 1],
                        preferred_element_type=jnp.float32) + b_ref[layer]
        h = _lstm_step(gates, hidden)

    # ---- Mish: x*tanh(softplus(x)) = x*(e^2x + 2e^x) / (e^2x + 2e^x + 2) ----
    # h is in (-1, 1) on every lane (garbage lanes included), so exp is safe.
    e = jnp.exp(h)
    num = e * (e + 2.0)
    h = h * num * pl.reciprocal(num + 2.0, approx=True)  # EUP vrcp, ~1e-3 rel err

    # ---- Linear (lane-dense 128-wide output slab) + tanh * 7 ----------------
    y = jnp.dot(h.astype(jnp.bfloat16), w_ref[num_layers - 1],
                preferred_element_type=jnp.float32) + b_ref[num_layers]
    out_ref[...] = jnp.tanh(y) * 7.0


def init_params(key):
    """PyTorch-style U(-1/sqrt(H), 1/sqrt(H)) init.

    Returns (packed, raw):
      packed = (w0 (16,128) bf16, w_rest (4,128,128) bf16, b_packed (5,1,128) f32)
      raw    = per-layer (W, b) in native PyTorch layout, for the reference.
    """
    H = HIDDEN
    bound = H ** -0.5
    raw = []
    w0 = jnp.zeros((INPUT_SIZE, LANES), jnp.float32)
    w_rest = jnp.zeros((NUM_LAYERS, LANES, LANES), jnp.float32)
    b_packed = jnp.zeros((NUM_LAYERS + 1, 1, LANES), jnp.float32)

    for layer in range(NUM_LAYERS):
        in_feat = INPUT_SIZE if layer == 0 else H
        key, kw, kbi, kbh = jax.random.split(key, 4)
        # PyTorch W_ih: (4H, in_feat), gate row order [i, f, g, o]
        w_ih = jax.random.uniform(kw, (4 * H, in_feat),
                                  minval=-bound, maxval=bound, dtype=jnp.float32)
        b_ih = jax.random.uniform(kbi, (4 * H,), minval=-bound, maxval=bound,
                                  dtype=jnp.float32)
        b_hh = jax.random.uniform(kbh, (4 * H,), minval=-bound, maxval=bound,
                                  dtype=jnp.float32)
        b = b_ih + b_hh
        raw.append((w_ih, b))

        w_i, w_g, w_o = w_ih[0:H], w_ih[2 * H:3 * H], w_ih[3 * H:4 * H]
        b_i, b_g, b_o = b[0:H], b[2 * H:3 * H], b[3 * H:4 * H]
        # packed columns: [0.5*i | 0.5*o | g | 0.5*o]   (f-gate unused, c0 == 0)
        w_cols = jnp.concatenate(
            [0.5 * w_i.T, 0.5 * w_o.T, w_g.T, 0.5 * w_o.T], axis=1)   # (in_feat, 128)
        b_cols = jnp.concatenate([0.5 * b_i, 0.5 * b_o, b_g, 0.5 * b_o])  # (128,)

        if layer == 0:
            w0 = w_cols                                  # true K=16 slab
        else:
            # deeper layers read the hidden state from lanes [2H:3H)
            w_rest = w_rest.at[layer - 1, 2 * H:3 * H, :].set(w_cols)
        b_packed = b_packed.at[layer, 0, :].set(b_cols)

    # Final Linear: PyTorch (OUTPUT, HIDDEN); rows [2H:3H), cols [0:OUTPUT)
    key, kwl, kbl = jax.random.split(key, 3)
    w_lin = jax.random.uniform(kwl, (OUTPUT, H), minval=-bound, maxval=bound,
                               dtype=jnp.float32)
    b_lin = jax.random.uniform(kbl, (OUTPUT,), minval=-bound, maxval=bound,
                               dtype=jnp.float32)
    raw.append((w_lin, b_lin))
    w_rest = w_rest.at[NUM_LAYERS - 1, 2 * H:3 * H, :OUTPUT].set(w_lin.T)
    b_packed = b_packed.at[NUM_LAYERS, 0, :OUTPUT].set(b_lin)

    packed = (w0.astype(jnp.bfloat16), w_rest.astype(jnp.bfloat16), b_packed)
    return packed, raw


def _row_tiling(batch):
    """(row_block, padded_rows): big tiles to amortize per-step overhead, and
    >= 2 grid steps when the batch allows so ("parallel",) can shard the grid
    across v7x's two TensorCores.  Always a multiple of 8 sublanes."""
    if batch <= 2 * _ROW_MIN:
        row_block = _ROW_MIN
    else:
        half = pl.cdiv(batch, 2)
        row_block = min(_ROW_MAX, pl.cdiv(half, 8) * 8)
    padded = pl.cdiv(batch, row_block) * row_block
    return row_block, padded


@jax.jit
def stock_price_predictor(x, w0, w_rest, b_packed):
    """Matches: forward(input_seq) with input_seq.view(len(input_seq), 1, -1)."""
    B = x.shape[0]
    x_flat = x.reshape(B, -1).astype(jnp.float32)            # (B, 16)
    row_block, b_pad = _row_tiling(B)
    x_pad = jnp.zeros((b_pad, INPUT_SIZE), jnp.float32).at[:B].set(x_flat)

    kernel = functools.partial(_predictor_kernel, hidden=HIDDEN,
                               num_layers=NUM_LAYERS)
    out = pl.pallas_call(
        kernel,
        out_shape=jax.ShapeDtypeStruct((b_pad, LANES), jnp.float32),
        grid=(b_pad // row_block,),
        in_specs=[
            pl.BlockSpec((row_block, INPUT_SIZE), lambda i: (i, 0)),
            # constant index_maps -> weights/biases stay VMEM-resident across tiles
            pl.BlockSpec((INPUT_SIZE, LANES), lambda i: (0, 0)),
            pl.BlockSpec((NUM_LAYERS, LANES, LANES), lambda i: (0, 0, 0)),
            pl.BlockSpec((NUM_LAYERS + 1, 1, LANES), lambda i: (0, 0, 0)),
        ],
        out_specs=pl.BlockSpec((row_block, LANES), lambda i: (i, 0)),
        compiler_params=pltpu.CompilerParams(
            dimension_semantics=("parallel",)),
    )(x_pad, w0, w_rest, b_packed)
    # Only 4 of 128 output lanes are live; a narrow / row-packed output layout
    # would cut writeback traffic at very large B (perf-review item) — at the
    # nominal batch the lane-dense slab + external slice is the cheaper option.
    return out[:B, :OUTPUT]


def _reference(x, raw):
    """Pure-JAX f32 reference implementing the original PyTorch math directly."""
    H = HIDDEN
    B = x.shape[0]
    h = x.reshape(B, -1).astype(jnp.float32)
    for layer in range(NUM_LAYERS):
        w_ih, b = raw[layer]
        z = h @ w_ih.T + b
        i = jax.nn.sigmoid(z[:, 0:H])
        g = jnp.tanh(z[:, 2 * H:3 * H])
        o = jax.nn.sigmoid(z[:, 3 * H:4 * H])
        c = i * g                       # f-gate * c0 == 0 drops out
        h = o * jnp.tanh(c)
    h = h * jnp.tanh(jax.nn.softplus(h))          # Mish
    w_lin, b_lin = raw[-1]
    y = h @ w_lin.T + b_lin
    return jnp.tanh(y) * 7.0


if __name__ == "__main__":
    key = jax.random.PRNGKey(0)
    key, k_x, k_p = jax.random.split(key, 3)

    # input_seq: (batch, observation_period_num, num_explain) = (2, 4, 4)
    x = jax.random.normal(k_x, (BATCH, OBS_PERIOD, NUM_EXPLAIN), dtype=jnp.float32)
    (w0, w_rest, b_packed), raw = init_params(k_p)

    out = stock_price_predictor(x, w0, w_rest, b_packed)
    out = jax.block_until_ready(out)

    ref = _reference(x, raw)
    assert out.shape == (BATCH, OUTPUT)
    # tolerance covers bf16 weights + approximate reciprocal in Mish
    assert jnp.allclose(out, ref, atol=5e-2, rtol=5e-2), (
        f"mismatch vs reference (max abs err {jnp.max(jnp.abs(out - ref))})")

    print("KERNEL_OK")
</pallas_src>

<mosaic_0001>
module attributes {stable_mosaic.version = 11 : i64} {
  func.func @_predictor_kernel(%arg0: i32, %arg1: memref<8x16xf32, #tpu.memory_space<vmem>>, %arg2: memref<16x128xbf16, #tpu.memory_space<vmem>>, %arg3: memref<4x128x128xbf16, #tpu.memory_space<vmem>>, %arg4: memref<5x1x128xf32, #tpu.memory_space<vmem>>, %arg5: memref<8x128xf32, #tpu.memory_space<vmem>>) attributes {dimension_semantics = [#tpu.dimension_semantics<parallel>], iteration_bounds = array<i64: 1>, scalar_prefetch = 0 : i64, scratch_operands = 0 : i64, tpu.core_type = #tpu.core_type<tc>, window_params = [{transform_indices = @transform_0, window_bounds = array<i64: 8, 16>}, {pipeline_mode = #tpu.pipeline_mode<synchronous>, transform_indices = @transform_1, window_bounds = array<i64: 16, 128>}, {pipeline_mode = #tpu.pipeline_mode<synchronous>, transform_indices = @transform_2, window_bounds = array<i64: 4, 128, 128>}, {pipeline_mode = #tpu.pipeline_mode<synchronous>, transform_indices = @transform_3, window_bounds = array<i64: 5, 1, 128>}, {transform_indices = @transform_4, window_bounds = array<i64: 8, 128>}]} {
    %c0 = arith.constant 0 : index
    %c0_0 = arith.constant 0 : index
    %0 = vector.load %arg1[%c0, %c0_0] : memref<8x16xf32, #tpu.memory_space<vmem>>, vector<8x16xf32>
    %1 = arith.truncf %0 : vector<8x16xf32> to vector<8x16xbf16>
    %c0_1 = arith.constant 0 : index
    %c0_2 = arith.constant 0 : index
    %2 = vector.load %arg2[%c0_1, %c0_2] : memref<16x128xbf16, #tpu.memory_space<vmem>>, vector<16x128xbf16>
    %cst = arith.constant dense<0.000000e+00> : vector<8x128xf32>
    %3 = tpu.matmul %1, %2, %cst {dimension_numbers = #tpu.dot_dimension_numbers<[1], [0], [0], [1], [0, 0, 1, 1], [], []>} : vector<8x16xbf16>, vector<16x128xbf16>, vector<8x128xf32> -> vector<8x128xf32>
    %c0_3 = arith.constant 0 : index
    %c0_4 = arith.constant 0 : index
    %c0_5 = arith.constant 0 : index
    %4 = vector.load %arg4[%c0_3, %c0_4, %c0_5] : memref<5x1x128xf32, #tpu.memory_space<vmem>>, vector<1x1x128xf32>
    %5 = vector.shape_cast %4 : vector<1x1x128xf32> to vector<1x128xf32>
    %6 = vector.broadcast %5 : vector<1x128xf32> to vector<8x128xf32>
    %7 = arith.addf %3, %6 : vector<8x128xf32>
    %8 = math.tanh %7 : vector<8x128xf32>
    %9 = vector.extract_strided_slice %8 {offsets = [0, 64], sizes = [8, 64], strides = [1, 1]} : vector<8x128xf32> to vector<8x64xf32>
    %10 = vector.extract_strided_slice %8 {offsets = [0, 0], sizes = [8, 64], strides = [1, 1]} : vector<8x128xf32> to vector<8x64xf32>
    %11 = tpu.concatenate %9, %10 in 1 : vector<8x64xf32>, vector<8x64xf32> -> vector<8x128xf32>
    %cst_6 = arith.constant 5.000000e-01 : f32
    %12 = vector.broadcast %cst_6 : f32 to vector<8x128xf32>
    %13 = arith.mulf %12, %11 : vector<8x128xf32>
    %cst_7 = arith.constant 5.000000e-01 : f32
    %14 = vector.broadcast %cst_7 : f32 to vector<8x128xf32>
    %15 = arith.addf %14, %13 : vector<8x128xf32>
    %16 = arith.mulf %15, %8 : vector<8x128xf32>
    %17 = vector.extract_strided_slice %8 {offsets = [0, 96], sizes = [8, 32], strides = [1, 1]} : vector<8x128xf32> to vector<8x32xf32>
    %18 = vector.extract_strided_slice %8 {offsets = [0, 0], sizes = [8, 96], strides = [1, 1]} : vector<8x128xf32> to vector<8x96xf32>
    %19 = tpu.concatenate %17, %18 in 1 : vector<8x32xf32>, vector<8x96xf32> -> vector<8x128xf32>
    %cst_8 = arith.constant 5.000000e-01 : f32
    %20 = vector.broadcast %cst_8 : f32 to vector<8x128xf32>
    %21 = arith.mulf %20, %19 : vector<8x128xf32>
    %cst_9 = arith.constant 5.000000e-01 : f32
    %22 = vector.broadcast %cst_9 : f32 to vector<8x128xf32>
    %23 = arith.addf %22, %21 : vector<8x128xf32>
    %24 = math.tanh %16 : vector<8x128xf32>
    %25 = arith.mulf %23, %24 : vector<8x128xf32>
    %26 = arith.truncf %25 : vector<8x128xf32> to vector<8x128xbf16>
    %c0_10 = arith.constant 0 : index
    %c0_11 = arith.constant 0 : index
    %c0_12 = arith.constant 0 : index
    %27 = vector.load %arg3[%c0_10, %c0_11, %c0_12] : memref<4x128x128xbf16, #tpu.memory_space<vmem>>, vector<1x128x128xbf16>
    %28 = vector.shape_cast %27 : vector<1x128x128xbf16> to vector<128x128xbf16>
    %cst_13 = arith.constant dense<0.000000e+00> : vector<8x128xf32>
    %29 = tpu.matmul %26, %28, %cst_13 {dimension_numbers = #tpu.dot_dimension_numbers<[1], [0], [0], [1], [0, 0, 1, 1], [], []>} : vector<8x128xbf16>, vector<128x128xbf16>, vector<8x128xf32> -> vector<8x128xf32>
    %c1 = arith.constant 1 : index
    %c0_14 = arith.constant 0 : index
    %c0_15 = arith.constant 0 : index
    %30 = vector.load %arg4[%c1, %c0_14, %c0_15] : memref<5x1x128xf32, #tpu.memory_space<vmem>>, vector<1x1x128xf32>
    %31 = vector.shape_cast %30 : vector<1x1x128xf32> to vector<1x128xf32>
    %32 = vector.broadcast %31 : vector<1x128xf32> to vector<8x128xf32>
    %33 = arith.addf %29, %32 : vector<8x128xf32>
    %34 = math.tanh %33 : vector<8x128xf32>
    %35 = vector.extract_strided_slice %34 {offsets = [0, 64], sizes = [8, 64], strides = [1, 1]} : vector<8x128xf32> to vector<8x64xf32>
    %36 = vector.extract_strided_slice %34 {offsets = [0, 0], sizes = [8, 64], strides = [1, 1]} : vector<8x128xf32> to vector<8x64xf32>
    %37 = tpu.concatenate %35, %36 in 1 : vector<8x64xf32>, vector<8x64xf32> -> vector<8x128xf32>
    %cst_16 = arith.constant 5.000000e-01 : f32
    %38 = vector.broadcast %cst_16 : f32 to vector<8x128xf32>
    %39 = arith.mulf %38, %37 : vector<8x128xf32>
    %cst_17 = arith.constant 5.000000e-01 : f32
    %40 = vector.broadcast %cst_17 : f32 to vector<8x128xf32>
    %41 = arith.addf %40, %39 : vector<8x128xf32>
    %42 = arith.mulf %41, %34 : vector<8x128xf32>
    %43 = vector.extract_strided_slice %34 {offsets = [0, 96], sizes = [8, 32], strides = [1, 1]} : vector<8x128xf32> to vector<8x32xf32>
    %44 = vector.extract_strided_slice %34 {offsets = [0, 0], sizes = [8, 96], strides = [1, 1]} : vector<8x128xf32> to vector<8x96xf32>
    %45 = tpu.concatenate %43, %44 in 1 : vector<8x32xf32>, vector<8x96xf32> -> vector<8x128xf32>
    %cst_18 = arith.constant 5.000000e-01 : f32
    %46 = vector.broadcast %cst_18 : f32 to vector<8x128xf32>
    %47 = arith.mulf %46, %45 : vector<8x128xf32>
    %cst_19 = arith.constant 5.000000e-01 : f32
    %48 = vector.broadcast %cst_19 : f32 to vector<8x128xf32>
    %49 = arith.addf %48, %47 : vector<8x128xf32>
    %50 = math.tanh %42 : vector<8x128xf32>
    %51 = arith.mulf %49, %50 : vector<8x128xf32>
    %52 = arith.truncf %51 : vector<8x128xf32> to vector<8x128xbf16>
    %c1_20 = arith.constant 1 : index
    %c0_21 = arith.constant 0 : index
    %c0_22 = arith.constant 0 : index
    %53 = vector.load %arg3[%c1_20, %c0_21, %c0_22] : memref<4x128x128xbf16, #tpu.memory_space<vmem>>, vector<1x128x128xbf16>
    %54 = vector.shape_cast %53 : vector<1x128x128xbf16> to vector<128x128xbf16>
    %cst_23 = arith.constant dense<0.000000e+00> : vector<8x128xf32>
    %55 = tpu.matmul %52, %54, %cst_23 {dimension_numbers = #tpu.dot_dimension_numbers<[1], [0], [0], [1], [0, 0, 1, 1], [], []>} : vector<8x128xbf16>, vector<128x128xbf16>, vector<8x128xf32> -> vector<8x128xf32>
    %c2 = arith.constant 2 : index
    %c0_24 = arith.constant 0 : index
    %c0_25 = arith.constant 0 : index
    %56 = vector.load %arg4[%c2, %c0_24, %c0_25] : memref<5x1x128xf32, #tpu.memory_space<vmem>>, vector<1x1x128xf32>
    %57 = vector.shape_cast %56 : vector<1x1x128xf32> to vector<1x128xf32>
    %58 = vector.broadcast %57 : vector<1x128xf32> to vector<8x128xf32>
    %59 = arith.addf %55, %58 : vector<8x128xf32>
    %60 = math.tanh %59 : vector<8x128xf32>
    %61 = vector.extract_strided_slice %60 {offsets = [0, 64], sizes = [8, 64], strides = [1, 1]} : vector<8x128xf32> to vector<8x64xf32>
    %62 = vector.extract_strided_slice %60 {offsets = [0, 0], sizes = [8, 64], strides = [1, 1]} : vector<8x128xf32> to vector<8x64xf32>
    %63 = tpu.concatenate %61, %62 in 1 : vector<8x64xf32>, vector<8x64xf32> -> vector<8x128xf32>
    %cst_26 = arith.constant 5.000000e-01 : f32
    %64 = vector.broadcast %cst_26 : f32 to vector<8x128xf32>
    %65 = arith.mulf %64, %63 : vector<8x128xf32>
    %cst_27 = arith.constant 5.000000e-01 : f32
    %66 = vector.broadcast %cst_27 : f32 to vector<8x128xf32>
    %67 = arith.addf %66, %65 : vector<8x128xf32>
    %68 = arith.mulf %67, %60 : vector<8x128xf32>
    %69 = vector.extract_strided_slice %60 {offsets = [0, 96], sizes = [8, 32], strides = [1, 1]} : vector<8x128xf32> to vector<8x32xf32>
    %70 = vector.extract_strided_slice %60 {offsets = [0, 0], sizes = [8, 96], strides = [1, 1]} : vector<8x128xf32> to vector<8x96xf32>
    %71 = tpu.concatenate %69, %70 in 1 : vector<8x32xf32>, vector<8x96xf32> -> vector<8x128xf32>
    %cst_28 = arith.constant 5.000000e-01 : f32
    %72 = vector.broadcast %cst_28 : f32 to vector<8x128xf32>
    %73 = arith.mulf %72, %71 : vector<8x128xf32>
    %cst_29 = arith.constant 5.000000e-01 : f32
    %74 = vector.broadcast %cst_29 : f32 to vector<8x128xf32>
    %75 = arith.addf %74, %73 : vector<8x128xf32>
    %76 = math.tanh %68 : vector<8x128xf32>
    %77 = arith.mulf %75, %76 : vector<8x128xf32>
    %78 = arith.truncf %77 : vector<8x128xf32> to vector<8x128xbf16>
    %c2_30 = arith.constant 2 : index
    %c0_31 = arith.constant 0 : index
    %c0_32 = arith.constant 0 : index
    %79 = vector.load %arg3[%c2_30, %c0_31, %c0_32] : memref<4x128x128xbf16, #tpu.memory_space<vmem>>, vector<1x128x128xbf16>
    %80 = vector.shape_cast %79 : vector<1x128x128xbf16> to vector<128x128xbf16>
    %cst_33 = arith.constant dense<0.000000e+00> : vector<8x128xf32>
    %81 = tpu.matmul %78, %80, %cst_33 {dimension_numbers = #tpu.dot_dimension_numbers<[1], [0], [0], [1], [0, 0, 1, 1], [], []>} : vector<8x128xbf16>, vector<128x128xbf16>, vector<8x128xf32> -> vector<8x128xf32>
    %c3 = arith.constant 3 : index
    %c0_34 = arith.constant 0 : index
    %c0_35 = arith.constant 0 : index
    %82 = vector.load %arg4[%c3, %c0_34, %c0_35] : memref<5x1x128xf32, #tpu.memory_space<vmem>>, vector<1x1x128xf32>
    %83 = vector.shape_cast %82 : vector<1x1x128xf32> to vector<1x128xf32>
    %84 = vector.broadcast %83 : vector<1x128xf32> to vector<8x128xf32>
    %85 = arith.addf %81, %84 : vector<8x128xf32>
    %86 = math.tanh %85 : vector<8x128xf32>
    %87 = vector.extract_strided_slice %86 {offsets = [0, 64], sizes = [8, 64], strides = [1, 1]} : vector<8x128xf32> to vector<8x64xf32>
    %88 = vector.extract_strided_slice %86 {offsets = [0, 0], sizes = [8, 64], strides = [1, 1]} : vector<8x128xf32> to vector<8x64xf32>
    %89 = tpu.concatenate %87, %88 in 1 : vector<8x64xf32>, vector<8x64xf32> -> vector<8x128xf32>
    %cst_36 = arith.constant 5.000000e-01 : f32
    %90 = vector.broadcast %cst_36 : f32 to vector<8x128xf32>
    %91 = arith.mulf %90, %89 : vector<8x128xf32>
    %cst_37 = arith.constant 5.000000e-01 : f32
    %92 = vector.broadcast %cst_37 : f32 to vector<8x128xf32>
    %93 = arith.addf %92, %91 : vector<8x128xf32>
    %94 = arith.mulf %93, %86 : vector<8x128xf32>
    %95 = vector.extract_strided_slice %86 {offsets = [0, 96], sizes = [8, 32], strides = [1, 1]} : vector<8x128xf32> to vector<8x32xf32>
    %96 = vector.extract_strided_slice %86 {offsets = [0, 0], sizes = [8, 96], strides = [1, 1]} : vector<8x128xf32> to vector<8x96xf32>
    %97 = tpu.concatenate %95, %96 in 1 : vector<8x32xf32>, vector<8x96xf32> -> vector<8x128xf32>
    %cst_38 = arith.constant 5.000000e-01 : f32
    %98 = vector.broadcast %cst_38 : f32 to vector<8x128xf32>
    %99 = arith.mulf %98, %97 : vector<8x128xf32>
    %cst_39 = arith.constant 5.000000e-01 : f32
    %100 = vector.broadcast %cst_39 : f32 to vector<8x128xf32>
    %101 = arith.addf %100, %99 : vector<8x128xf32>
    %102 = math.tanh %94 : vector<8x128xf32>
    %103 = arith.mulf %101, %102 : vector<8x128xf32>
    %104 = math.exp %103 : vector<8x128xf32>
    %cst_40 = arith.constant 2.000000e+00 : f32
    %105 = vector.broadcast %cst_40 : f32 to vector<8x128xf32>
    %106 = arith.addf %104, %105 : vector<8x128xf32>
    %107 = arith.mulf %104, %106 : vector<8x128xf32>
    %108 = arith.mulf %103, %107 : vector<8x128xf32>
    %cst_41 = arith.constant 2.000000e+00 : f32
    %109 = vector.broadcast %cst_41 : f32 to vector<8x128xf32>
    %110 = arith.addf %107, %109 : vector<8x128xf32>
    %111 = tpu.reciprocal %110 {approx = true} : vector<8x128xf32> -> vector<8x128xf32>
    %112 = arith.mulf %108, %111 : vector<8x128xf32>
    %113 = arith.truncf %112 : vector<8x128xf32> to vector<8x128xbf16>
    %c3_42 = arith.constant 3 : index
    %c0_43 = arith.constant 0 : index
    %c0_44 = arith.constant 0 : index
    %114 = vector.load %arg3[%c3_42, %c0_43, %c0_44] : memref<4x128x128xbf16, #tpu.memory_space<vmem>>, vector<1x128x128xbf16>
    %115 = vector.shape_cast %114 : vector<1x128x128xbf16> to vector<128x128xbf16>
    %cst_45 = arith.constant dense<0.000000e+00> : vector<8x128xf32>
    %116 = tpu.matmul %113, %115, %cst_45 {dimension_numbers = #tpu.dot_dimension_numbers<[1], [0], [0], [1], [0, 0, 1, 1], [], []>} : vector<8x128xbf16>, vector<128x128xbf16>, vector<8x128xf32> -> vector<8x128xf32>
    %c4 = arith.constant 4 : index
    %c0_46 = arith.constant 0 : index
    %c0_47 = arith.constant 0 : index
    %117 = vector.load %arg4[%c4, %c0_46, %c0_47] : memref<5x1x128xf32, #tpu.memory_space<vmem>>, vector<1x1x128xf32>
    %118 = vector.shape_cast %117 : vector<1x1x128xf32> to vector<1x128xf32>
    %119 = vector.broadcast %118 : vector<1x128xf32> to vector<8x128xf32>
    %120 = arith.addf %116, %119 : vector<8x128xf32>
    %121 = math.tanh %120 : vector<8x128xf32>
    %cst_48 = arith.constant 7.000000e+00 : f32
    %122 = vector.broadcast %cst_48 : f32 to vector<8x128xf32>
    %123 = arith.mulf %121, %122 : vector<8x128xf32>
    %c0_49 = arith.constant 0 : index
    %c0_50 = arith.constant 0 : index
    %124 = vector.load %arg5[%c0_49, %c0_50] : memref<8x128xf32, #tpu.memory_space<vmem>>, vector<8x128xf32>
    tpu.vector_store %arg5[%c0_49, %c0_50], %123 {strides = array<i32>} : memref<8x128xf32, #tpu.memory_space<vmem>>, vector<8x128xf32>,
    return
  }
  func.func @transform_0(%arg0: i32) -> (i32, i32) {
    %c0_i32 = arith.constant 0 : i32
    %c0_i32_0 = arith.constant 0 : i32
    return %arg0, %c0_i32 : i32, i32
  }
  func.func @transform_1(%arg0: i32) -> (i32, i32) {
    %c0_i32 = arith.constant 0 : i32
    %c0_i32_0 = arith.constant 0 : i32
    %c0_i32_1 = arith.constant 0 : i32
    return %c0_i32, %c0_i32_0 : i32, i32
  }
  func.func @transform_2(%arg0: i32) -> (i32, i32, i32) {
    %c0_i32 = arith.constant 0 : i32
    %c0_i32_0 = arith.constant 0 : i32
    %c0_i32_1 = arith.constant 0 : i32
    %c0_i32_2 = arith.constant 0 : i32
    return %c0_i32, %c0_i32_0, %c0_i32_1 : i32, i32, i32
  }
  func.func @transform_3(%arg0: i32) -> (i32, i32, i32) {
    %c0_i32 = arith.constant 0 : i32
    %c0_i32_0 = arith.constant 0 : i32
    %c0_i32_1 = arith.constant 0 : i32
    %c0_i32_2 = arith.constant 0 : i32
    return %c0_i32, %c0_i32_0, %c0_i32_1 : i32, i32, i32
  }
  func.func @transform_4(%arg0: i32) -> (i32, i32) {
    %c0_i32 = arith.constant 0 : i32
    %c0_i32_0 = arith.constant 0 : i32
    return %arg0, %c0_i32 : i32, i32
  }
}

</mosaic_0001>

<bundles_post_ra>
// kernel: stock_price_predictor.1
= control target key start
LH: loop header
LB: loop body
LE: loop exit
PB: predicated region body
PF: predicated region fallthrough
CT: control target
= control target key end

     0   :  { %9 = vsyncpa [#allocation3], 0  ;;  %s874_s15 = smov [#allocation2]   ;;  %s985_s0 = inlined_call_operand.vmem [shape: f32[8,16], index: 0, kind: input, shape index: {}]   ;;  %s986_s1 = inlined_call_operand.vmem [shape: bf16[16,128], index: 1, kind: input, shape index: {}]   ;;  %s987_s2 = inlined_call_operand.hbm [shape: bf16[4,128,128], index: 2, kind: input, shape index: {}]   ;;  %s988_s3 = inlined_call_operand.vmem [shape: f32[5,1,128], index: 3, kind: input, shape index: {}]   ;;  %s989_s4 = inlined_call_operand.vmem [shape: f32[8,128], index: 4, kind: output, shape index: {}]  }
   0x1   :  { %s19_s16 = sshll.u32 %s874_s15, 4  ;;  %s20_s16 = int_to_ptr.vmem [resolvable:$true] %s19_s16 }
   0x2   :  { %s860_s17 = scalar_lea.vmem %s20_s16, 4096  ;;  %p865_p1 = scmp.lt.s32.totalorder %s20_s16, %s20_s16 }
   0x3   :  { %p861_p0 = scmp.ne.s32.totalorder %s20_s16, %s860_s17  ;;  %p866_p2 = scmp.lt.s32.totalorder %s860_s17, %s860_s17 }
   0x5   :  { %p867_p3 = por %p866_p2, %p865_p1 }
   0x7   :  { %p868_p4 = pnand %p867_p3, %p861_p0 }
   0x9   :  { %871 = shalt.err (!%p868_p4)
}
   0xa   :  { %s875_s18 = smov 64   ;;  %s876_s19 = smov 4  }
   0xb   :  { %25 = dma.hbm_to_vmem [thread:$0]  %s987_s2, 4096, %s20_s16, [#allocation3], %s875_s18, %s875_s18, %s876_s19  }
   0xc   :  { %872 = dma.done.wait [#allocation3], 4096  }
   0xd   :  { %873 = vsyncadd [#allocation3], 4294963200  ;;  %v877_v0 = vmov 0.0   ;;  %vm878_vm0 = vmmov 0   ;;  %v797_v1 = vld [vmem:[%s986_s1] sm:$0xff]   ;;  %vm49_vm1 = vcmask 130048  }
   0xe   :  { %705 = vmatprep.subr.bf16.mxu0 %v877_v0  ;;  %707 = vmatprep.mubr.msk.bf16.mxu0 %vm878_vm0, %v877_v0  ;;  %v32_v2 = vld [vmem:[%s985_s0] sm:$0xff]  ;;  %v798_v4 = vld [vmem:[#allocation2 + $0x38] sm:$0xff]   ;;  %v799_v5 = vld [vmem:[#allocation2 + $0x30] sm:$0xff]   ;;  %s879_s0 = smov 32  }
   0xf   :  { %711 = vmatprep.subr.bf16.mxu1 %v877_v0  ;;  %727 = vmatprep.mubr.msk.bf16.mxu1 %vm878_vm0, %v877_v0  ;;  %v33_v3 = vpack.c.bf16 %v32_v2, %v32_v2  ;;  %v624_v6 = vld [vmem:[%s988_s3] ss:$0 sm:$0xff]  ;;  %v800_v10 = vld [vmem:[#allocation2 + $0x28] sm:$0xff]   ;;  %v802_v14 = vld [vmem:[#allocation2 + $0x18] sm:$0xff]  }
  0x10   :  { %706 = vmatpush3.bf16.msra.mxu0 %v797_v1  ;;  %712 = vmatpush3.bf16.msra.mxu1 %v798_v4  ;;  %v801_v13 = vld [vmem:[#allocation2 + $0x20] sm:$0xff]   ;;  %v803_v15 = vld [vmem:[#allocation2 + $0x10] sm:$0xff]   ;;  %v804_v17 = vld [vmem:[#allocation2 + $0x8] sm:$0xff]  }
  0x11   :  { %731 = vmatprep.subr.bf16.mxu0 %v877_v0  ;;  %713 = vmatprep.subr.bf16.mxu1 %v877_v0  ;;  %v805_v18 = vld [vmem:[#allocation2] sm:$0xff]   ;;  %v806_v29 = vld [vmem:[#allocation2 + $0x78] sm:$0xff]   ;;  %v807_v30 = vld [vmem:[#allocation2 + $0x70] sm:$0xff]  }
  0x12   :  { %v628_v31 = vld [vmem:[%s988_s3 + $0x1] ss:$0 sm:$0xff]  ;;  %v808_v35 = vld [vmem:[#allocation2 + $0x68] sm:$0xff]   ;;  %v810_v39 = vld [vmem:[#allocation2 + $0x58] sm:$0xff]  }
  0x13   :  { %708 = vmatmul.mubr.msk.bf16.vlgmr.msra.gmra.mxu0 %vm49_vm1, %v33_v3  ;;  %v809_v38 = vld [vmem:[#allocation2 + $0x60] sm:$0xff]   ;;  %v811_v40 = vld [vmem:[#allocation2 + $0x50] sm:$0xff]   ;;  %v812_v42 = vld [vmem:[#allocation2 + $0x48] sm:$0xff]  }
  0x14   :  { %747 = vmatprep.mubr.msk.bf16.mxu0 %vm878_vm0, %v877_v0  ;;  %714 = vmatpush3.bf16.msra.mxu1 %v799_v5  ;;  %v813_v43 = vld [vmem:[#allocation2 + $0x40] sm:$0xff]   ;;  %v814_v54 = vld [vmem:[#allocation2 + $0xb8] sm:$0xff]   ;;  %v815_v55 = vld [vmem:[#allocation2 + $0xb0] sm:$0xff]  }
  0x15   :  { %715 = vmatprep.subr.bf16.mxu1 %v877_v0  ;;  %732 = vmatpush3.bf16.msra.mxu0 %v806_v29  ;;  %v638_v56 = vld [vmem:[%s988_s3 + $0x2] ss:$0 sm:$0xff]  ;;  %v816_v60 = vld [vmem:[#allocation2 + $0xa8] sm:$0xff]   ;;  %v818_v1 = vld [vmem:[#allocation2 + $0x98] sm:$0xff]  }
  0x16   :  { %733 = vmatprep.subr.bf16.mxu0 %v877_v0  ;;  %v817_v63 = vld [vmem:[#allocation2 + $0xa0] sm:$0xff]   ;;  %v819_v2 = vld [vmem:[#allocation2 + $0x90] sm:$0xff]   ;;  %v820_v4 = vld [vmem:[#allocation2 + $0x88] sm:$0xff]  }
  0x17   :  { %v821_v5 = vld [vmem:[#allocation2 + $0x80] sm:$0xff]   ;;  %v828_v29 = vld [vmem:[#allocation2 + $0xc8] sm:$0xff]  }
  0x18   :  { %716 = vmatpush3.bf16.msra.mxu1 %v800_v10 }
  0x19   :  { %717 = vmatprep.subr.bf16.mxu1 %v877_v0  ;;  %734 = vmatpush3.bf16.msra.mxu0 %v807_v30  ;;  %v829_v30 = vld [vmem:[#allocation2 + $0xc0] sm:$0xff]  }
  0x1a   :  { %735 = vmatprep.subr.bf16.mxu0 %v877_v0 }
  0x1c   :  { %718 = vmatpush3.bf16.msra.mxu1 %v801_v13 }
  0x1d   :  { %719 = vmatprep.subr.bf16.mxu1 %v877_v0  ;;  %736 = vmatpush3.bf16.msra.mxu0 %v808_v35 }
  0x1e   :  { %737 = vmatprep.subr.bf16.mxu0 %v877_v0 }
  0x20   :  { %720 = vmatpush3.bf16.msra.mxu1 %v802_v14 }
  0x21   :  { %721 = vmatprep.subr.bf16.mxu1 %v877_v0  ;;  %738 = vmatpush3.bf16.msra.mxu0 %v809_v38 }
  0x22   :  { %739 = vmatprep.subr.bf16.mxu0 %v877_v0 }
  0x24   :  { %722 = vmatpush3.bf16.msra.mxu1 %v803_v15 }
  0x25   :  { %723 = vmatprep.subr.bf16.mxu1 %v877_v0  ;;  %740 = vmatpush3.bf16.msra.mxu0 %v810_v39 }
  0x26   :  { %741 = vmatprep.subr.bf16.mxu0 %v877_v0 }
  0x28   :  { %724 = vmatpush3.bf16.msra.mxu1 %v804_v17 }
  0x29   :  { %725 = vmatprep.subr.bf16.mxu1 %v877_v0  ;;  %742 = vmatpush3.bf16.msra.mxu0 %v811_v40 }
  0x2a   :  { %743 = vmatprep.subr.bf16.mxu0 %v877_v0 }
  0x2c   :  { %726 = vmatpush3.bf16.msra.mxu1 %v805_v18 }
  0x2d   :  { %751 = vmatprep.subr.bf16.mxu1 %v877_v0  ;;  %744 = vmatpush3.bf16.msra.mxu0 %v812_v42 }
  0x2e   :  { %745 = vmatprep.subr.bf16.mxu0 %v877_v0 }
  0x31   :  { %746 = vmatpush3.bf16.msra.mxu0 %v813_v43 }
  0x32   :  { %771 = vmatprep.subr.bf16.mxu0 %v877_v0 }
  0xd3   :  { %v87_v7 = vpop.f32.mrf.mxu0 }
  0xd4   :  { %v88_v8 = vadd.f32 %v624_v6, %v87_v7 }
  0xd5   :  { %v709_v9 = vpop.f32.mrf.mxu0 }
  0xd6   :  { %830 = vtanh.f32 %v88_v8 }
  0xd7   :  { %v90_v11 = vpop.f32.mrf.mxu0 }
  0xd9   :  { %v710_v12 = vpop.f32.mrf.mxu0 }
  0xe3   :  { %v831_v16 = vpop.eup %830 }
  0xe4   :  { %95 = vrot.lane.b32.xlu0 %v831_v16, %s875_s18 }
  0xe8   :  { %101 = vrot.lane.b32.xlu0 %v831_v16, %s879_s0 }
 0x156   :  { %v96_v19 = vpop.permute.xlu0 %95 }
 0x157   :  { %v98_v20 = vmul.f32 0.5, %v96_v19 }
 0x159   :  { %v99_v21 = vadd.f32 0.5, %v98_v20 }
 0x15a   :  { %v102_v23 = vpop.permute.xlu0 %101 }
 0x15b   :  { %v100_v22 = vmul.f32 %v831_v16, %v99_v21  ;;  %v104_v24 = vmul.f32 0.5, %v102_v23  ;;  %v648_v16 = vld [vmem:[%s988_s3 + $0x3] ss:$0 sm:$0xff]  ;;  %v823_v23 = vld [vmem:[#allocation2 + $0xf0] sm:$0xff]  }
 0x15d   :  { %832 = vtanh.f32 %v100_v22  ;;  %v105_v25 = vadd.f32 0.5, %v104_v24  ;;  %v822_v22 = vld [vmem:[#allocation2 + $0xf8] sm:$0xff]  }
 0x16a   :  { %v833_v26 = vpop.eup %832 }
 0x16b   :  { %v107_v27 = vmul.f32 %v833_v26, %v105_v25  ;;  %v824_v25 = vld [vmem:[#allocation2 + $0xe8] sm:$0xff]   ;;  %v825_v26 = vld [vmem:[#allocation2 + $0xe0] sm:$0xff]  }
 0x16d   :  { %v108_v28 = vpack.c.bf16 %v107_v27, %v107_v27  ;;  %v826_v27 = vld [vmem:[#allocation2 + $0xd8] sm:$0xff]  }
 0x16f   :  { %728 = vmatmul.mubr.bf16.vlgmr.msra.gmra.mxu1 %v108_v28  ;;  %v827_v28 = vld [vmem:[#allocation2 + $0xd0] sm:$0xff]  }
 0x170   :  { %767 = vmatprep.mubr.msk.bf16.mxu1 %vm878_vm0, %v877_v0  ;;  %752 = vmatpush3.bf16.msra.mxu1 %v814_v54 }
 0x171   :  { %753 = vmatprep.subr.bf16.mxu1 %v877_v0 }
 0x174   :  { %754 = vmatpush3.bf16.msra.mxu1 %v815_v55 }
 0x175   :  { %755 = vmatprep.subr.bf16.mxu1 %v877_v0 }
 0x178   :  { %756 = vmatpush3.bf16.msra.mxu1 %v816_v60 }
 0x179   :  { %757 = vmatprep.subr.bf16.mxu1 %v877_v0 }
 0x17c   :  { %758 = vmatpush3.bf16.msra.mxu1 %v817_v63 }
 0x17d   :  { %759 = vmatprep.subr.bf16.mxu1 %v877_v0 }
 0x180   :  { %760 = vmatpush3.bf16.msra.mxu1 %v818_v1 }
 0x181   :  { %761 = vmatprep.subr.bf16.mxu1 %v877_v0 }
 0x184   :  { %762 = vmatpush3.bf16.msra.mxu1 %v819_v2 }
 0x185   :  { %763 = vmatprep.subr.bf16.mxu1 %v877_v0 }
 0x188   :  { %764 = vmatpush3.bf16.msra.mxu1 %v820_v4 }
 0x189   :  { %765 = vmatprep.subr.bf16.mxu1 %v877_v0 }
 0x18c   :  { %766 = vmatpush3.bf16.msra.mxu1 %v821_v5 }
 0x22f   :  { %v215_v32 = vpop.f32.mrf.mxu1 }
 0x230   :  { %v216_v33 = vadd.f32 %v628_v31, %v215_v32 }
 0x231   :  { %v729_v34 = vpop.f32.mrf.mxu1 }
 0x232   :  { %834 = vtanh.f32 %v216_v33 }
 0x233   :  { %v218_v36 = vpop.f32.mrf.mxu1 }
 0x235   :  { %v730_v37 = vpop.f32.mrf.mxu1 }
 0x23f   :  { %v835_v41 = vpop.eup %834 }
 0x240   :  { %223 = vrot.lane.b32.xlu1 %v835_v41, %s875_s18 }
 0x244   :  { %229 = vrot.lane.b32.xlu1 %v835_v41, %s879_s0 }
 0x2b2   :  { %v224_v44 = vpop.permute.xlu1 %223 }
 0x2b3   :  { %v226_v45 = vmul.f32 0.5, %v224_v44 }
 0x2b5   :  { %v227_v46 = vadd.f32 0.5, %v226_v45 }
 0x2b6   :  { %v230_v48 = vpop.permute.xlu1 %229 }
 0x2b7   :  { %v228_v47 = vmul.f32 %v835_v41, %v227_v46  ;;  %v232_v49 = vmul.f32 0.5, %v230_v48  ;;  %v658_v48 = vld [vmem:[%s988_s3 + $0x4] ss:$0 sm:$0xff] }
 0x2b9   :  { %836 = vtanh.f32 %v228_v47  ;;  %v233_v50 = vadd.f32 0.5, %v232_v49 }
 0x2c6   :  { %v837_v51 = vpop.eup %836 }
 0x2c7   :  { %v235_v52 = vmul.f32 %v837_v51, %v233_v50 }
 0x2c9   :  { %v236_v53 = vpack.c.bf16 %v235_v52, %v235_v52 }
 0x2cb   :  { %748 = vmatmul.mubr.bf16.vlgmr.msra.gmra.mxu0 %v236_v53 }
 0x2cc   :  { %787 = vmatprep.mubr.msk.bf16.mxu0 %vm878_vm0, %v877_v0  ;;  %772 = vmatpush3.bf16.msra.mxu0 %v822_v22 }
 0x2cd   :  { %773 = vmatprep.subr.bf16.mxu0 %v877_v0 }
 0x2d0   :  { %774 = vmatpush3.bf16.msra.mxu0 %v823_v23 }
 0x2d1   :  { %775 = vmatprep.subr.bf16.mxu0 %v877_v0 }
 0x2d4   :  { %776 = vmatpush3.bf16.msra.mxu0 %v824_v25 }
 0x2d5   :  { %777 = vmatprep.subr.bf16.mxu0 %v877_v0 }
 0x2d8   :  { %778 = vmatpush3.bf16.msra.mxu0 %v825_v26 }
 0x2d9   :  { %779 = vmatprep.subr.bf16.mxu0 %v877_v0 }
 0x2dc   :  { %780 = vmatpush3.bf16.msra.mxu0 %v826_v27 }
 0x2dd   :  { %781 = vmatprep.subr.bf16.mxu0 %v877_v0 }
 0x2e0   :  { %782 = vmatpush3.bf16.msra.mxu0 %v827_v28 }
 0x2e1   :  { %783 = vmatprep.subr.bf16.mxu0 %v877_v0 }
 0x2e4   :  { %784 = vmatpush3.bf16.msra.mxu0 %v828_v29 }
 0x2e5   :  { %785 = vmatprep.subr.bf16.mxu0 %v877_v0 }
 0x2e8   :  { %786 = vmatpush3.bf16.msra.mxu0 %v829_v30 }
 0x38b   :  { %v344_v57 = vpop.f32.mrf.mxu0 }
 0x38c   :  { %v345_v58 = vadd.f32 %v638_v56, %v344_v57 }
 0x38d   :  { %v749_v59 = vpop.f32.mrf.mxu0 }
 0x38e   :  { %838 = vtanh.f32 %v345_v58 }
 0x38f   :  { %v347_v61 = vpop.f32.mrf.mxu0 }
 0x391   :  { %v750_v62 = vpop.f32.mrf.mxu0 }
 0x39b   :  { %v839_v3 = vpop.eup %838 }
 0x39c   :  { %358 = vrot.lane.b32.xlu1 %v839_v3, %s879_s0  ;;  %352 = vrot.lane.b32.xlu0 %v839_v3, %s875_s18 }
 0x40e   :  { %v353_v6 = vpop.permute.xlu0 %352  ;;  %v359_v10 = vpop.permute.xlu1 %358 }
 0x40f   :  { %v355_v7 = vmul.f32 0.5, %v353_v6  ;;  %v361_v11 = vmul.f32 0.5, %v359_v10 }
 0x411   :  { %v356_v8 = vadd.f32 0.5, %v355_v7  ;;  %v362_v12 = vadd.f32 0.5, %v361_v11 }
 0x413   :  { %v357_v9 = vmul.f32 %v839_v3, %v356_v8 }
 0x415   :  { %840 = vtanh.f32 %v357_v9 }
 0x422   :  { %v841_v13 = vpop.eup %840 }
 0x423   :  { %v364_v14 = vmul.f32 %v841_v13, %v362_v12 }
 0x425   :  { %v365_v15 = vpack.c.bf16 %v364_v14, %v364_v14 }
 0x427   :  { %768 = vmatmul.mubr.bf16.vlgmr.msra.gmra.mxu1 %v365_v15 }
 0x4e7   :  { %v473_v17 = vpop.f32.mrf.mxu1 }
 0x4e8   :  { %v474_v18 = vadd.f32 %v648_v16, %v473_v17 }
 0x4e9   :  { %v769_v19 = vpop.f32.mrf.mxu1 }
 0x4ea   :  { %842 = vtanh.f32 %v474_v18 }
 0x4eb   :  { %v476_v20 = vpop.f32.mrf.mxu1 }
 0x4ed   :  { %v770_v21 = vpop.f32.mrf.mxu1 }
 0x4f7   :  { %v843_v24 = vpop.eup %842 }
 0x4f8   :  { %487 = vrot.lane.b32.xlu1 %v843_v24, %s879_s0  ;;  %481 = vrot.lane.b32.xlu0 %v843_v24, %s875_s18 }
 0x56a   :  { %v482_v31 = vpop.permute.xlu0 %481  ;;  %v488_v35 = vpop.permute.xlu1 %487 }
 0x56b   :  { %v484_v32 = vmul.f32 0.5, %v482_v31  ;;  %v490_v36 = vmul.f32 0.5, %v488_v35 }
 0x56d   :  { %v485_v33 = vadd.f32 0.5, %v484_v32  ;;  %v491_v37 = vadd.f32 0.5, %v490_v36 }
 0x56f   :  { %v486_v34 = vmul.f32 %v843_v24, %v485_v33 }
 0x571   :  { %844 = vtanh.f32 %v486_v34 }
 0x57e   :  { %v845_v38 = vpop.eup %844 }
 0x57f   :  { %v493_v39 = vmul.f32 %v845_v38, %v491_v37 }
 0x581   :  { %v494_v40 = vmul.f32 1.442695, %v493_v39 }
 0x583   :  { %846 = vpow2.f32 %v494_v40 }
 0x590   :  { %v847_v41 = vpop.eup %846 }
 0x591   :  { %v496_v42 = vadd.f32 2.0, %v847_v41 }
 0x593   :  { %v497_v43 = vmul.f32 %v847_v41, %v496_v42 }
 0x595   :  { %v499_v44 = vadd.f32 2.0, %v497_v43  ;;  %v498_v45 = vmul.f32 %v497_v43, %v493_v39 }
 0x597   :  { %848 = vrcp.f32 %v499_v44 }
 0x5a4   :  { %v849_v0 = vpop.eup %848 }
 0x5a5   :  { %v501_v46 = vmul.f32 %v849_v0, %v498_v45 }
 0x5a7   :  { %v502_v47 = vpack.c.bf16 %v501_v46, %v501_v46 }
 0x5a9   :  { %788 = vmatmul.mubr.bf16.vlgmr.msra.gmra.mxu0 %v502_v47 }
 0x669   :  { %v610_v49 = vpop.f32.mrf.mxu0 }
 0x66a   :  { %v611_v50 = vadd.f32 %v658_v48, %v610_v49 }
 0x66b   :  { %v789_v51 = vpop.f32.mrf.mxu0 }
 0x66c   :  { %850 = vtanh.f32 %v611_v50 }
 0x66d   :  { %v613_v52 = vpop.f32.mrf.mxu0 }
 0x66f   :  { %v790_v53 = vpop.f32.mrf.mxu0 }
 0x679   :  { %v851_v54 = vpop.eup %850 }
 0x67a   :  { %v617_v55 = vmul.f32 7.0, %v851_v54 }
 0x67c   :  { %618 = vst [vmem:[%s989_s4] sm:$0xff] %v617_v55 }
 0x67d   :  { %623 = vsyncpa [#allocation3], 1 }

</bundles_post_ra>
